<compile_context>
chip_gen: v7x
topology: tpu7x:2x2x1
jax: 0.10.0
libtpu: 0.0.40
codegen_flags: <defaults>
</compile_context>

<pallas_src>
import functools
import math

import jax
import jax.numpy as jnp
from jax.experimental import pallas as pl
from jax.experimental.pallas import tpu as pltpu

_EPS = 1e-5


# --------------------------------------------------------------------------- #
# Kernels
# --------------------------------------------------------------------------- #
def _ln_dense_kernel(x_ref, w_ref, o_ref, *, inv_c):
    """Direct path: normalized axis C is the lane (last) axis of the block."""
    x = x_ref[...].astype(jnp.float32)                       # (tm, C)
    mu = jnp.sum(x, axis=-1, keepdims=True) * inv_c
    d = x - mu
    var = jnp.sum(d * d, axis=-1, keepdims=True) * inv_c     # unbiased=False
    inv = jax.lax.rsqrt(var + _EPS)
    w = w_ref[...].astype(jnp.float32)
    o_ref[...] = (x * inv * w).astype(o_ref.dtype)           # mean NOT subtracted


def _ln_packed_kernel(x_ref, w_ref, red_ref, exp_ref, o_ref, *, inv_c):
    """Packed path: each L-lane row holds k = L // C independent channel groups.

    red_ref: (L, k) 0/1 matrix -> x @ red gives per-segment sums as (tm, k).
    exp_ref: (k, L) 0/1 matrix -> broadcasts a (tm, k) value back across its
             C-lane segment.  Both matmuls are tiny and run on the otherwise
             idle MXU; every elementwise op / store stays fully lane-dense.
    """
    x = x_ref[...].astype(jnp.float32)                        # (tm, L)
    red = red_ref[...]                                        # (L, k) f32
    expd = exp_ref[...]                                       # (k, L) f32
    dot = functools.partial(jnp.dot, preferred_element_type=jnp.float32,
                            precision=jax.lax.Precision.HIGHEST)
    s1 = dot(x, red)                                          # (tm, k) sums
    s2 = dot(x * x, red)                                      # (tm, k) sum of sq
    mu = s1 * inv_c
    var = s2 * inv_c - mu * mu                                # single-pass, f32
    inv = jax.lax.rsqrt(var + _EPS)                           # (tm, k)
    inv_full = dot(inv, expd)                                 # (tm, L) broadcast
    w = w_ref[...].astype(jnp.float32)                        # weight tiled k times
    o_ref[...] = (x * inv_full * w).astype(o_ref.dtype)


# --------------------------------------------------------------------------- #
# Sizing helpers
# --------------------------------------------------------------------------- #
def _round_up(a, m):
    return -(-a // m) * m


def _vmem_config():
    """Per-chip scoped-VMEM limit and tile budget (v5e/v6e: 128 MiB physical,
    v7x: 64 MiB)."""
    try:
        info = pltpu.get_tpu_info()
        vmem_cap = int(info.vmem_capacity_bytes)
    except Exception:
        vmem_cap = 64 * 1024 * 1024            # conservative (v7x-sized)
    vmem_limit = max(32 * 1024 * 1024, min(vmem_cap // 2, 64 * 1024 * 1024))
    tile_budget = (vmem_limit * 3) // 4        # headroom for consts / compiler
    return vmem_limit, tile_budget


def _pick_row_tile(rows, lane_width, itemsize, tile_budget,
                   target_tile_bytes=4 * 1024 * 1024, min_grid_steps=4):
    """Row tile: dtype-aware, ~4 MiB input tiles, within the VMEM budget
    (double-buffered in+out plus ~3 f32 in-kernel temporaries), and split into
    >= min_grid_steps blocks when rows allow (>= 2 per TensorCore on v7x) while
    keeping each tile >= ~1 MiB so pipelining stays effective."""
    if rows <= 8:
        return max(rows, 1)                    # single block == full dim
    row_io_bytes = lane_width * itemsize
    vmem_per_row = 4 * row_io_bytes + 3 * lane_width * 4
    tm_vmem = max(8, tile_budget // vmem_per_row)
    tm_target = max(8, target_tile_bytes // row_io_bytes)
    tm = min(tm_vmem, tm_target)
    tm = max(8, (tm // 8) * 8)
    rows8 = _round_up(rows, 8)
    tm = min(tm, rows8)
    min_tm = max(8, ((1024 * 1024) // row_io_bytes // 8) * 8)
    while tm > min_tm and -(-rows8 // tm) < min_grid_steps:
        tm = max(min_tm, ((tm // 2) // 8) * 8)
    return tm


# --------------------------------------------------------------------------- #
# pallas_call wrappers
# --------------------------------------------------------------------------- #
def _direct_call(x2d, w_row, tm, compiler_params):
    R, C = x2d.shape
    grid = (pl.cdiv(R, tm),)
    return pl.pallas_call(
        functools.partial(_ln_dense_kernel, inv_c=1.0 / C),
        out_shape=jax.ShapeDtypeStruct((R, C), x2d.dtype),
        grid_spec=pltpu.PrefetchScalarGridSpec(
            num_scalar_prefetch=0,
            grid=grid,
            in_specs=[
                pl.BlockSpec((tm, C), lambda i: (i, 0)),
                pl.BlockSpec((1, C), lambda i: (0, 0)),       # constant block
            ],
            out_specs=pl.BlockSpec((tm, C), lambda i: (i, 0)),
        ),
        compiler_params=compiler_params,
    )(x2d, w_row)


def biasfree_layernorm(x, weight):
    """x: (..., C) array; weight: (C,). Returns the same shape/dtype as x."""
    orig_shape = x.shape
    C = int(orig_shape[-1])
    assert weight.shape == (C,)

    x2d = x.reshape(-1, C)
    R = x2d.shape[0]
    itemsize = jnp.dtype(x.dtype).itemsize

    vmem_limit, tile_budget = _vmem_config()
    compiler_params = pltpu.CompilerParams(
        dimension_semantics=("parallel",),
        vmem_limit_bytes=vmem_limit,
    )

    # Lane-packing factor: smallest k with (k*C) % 128 == 0.
    k = 128 // math.gcd(C, 128)
    L = k * C
    use_packed = (k > 1) and (R >= k) and (L <= 2048)

    if not use_packed:
        # Direct path (lane-dense whenever C is a multiple of 128).
        w_row = weight.reshape(1, C)
        tm = _pick_row_tile(R, C, itemsize, tile_budget)
        return _direct_call(x2d, w_row, tm, compiler_params).reshape(orig_shape)

    # ---------------- packed path ---------------- #
    rows_full = R // k
    n_main = rows_full * k
    x_main = x2d if n_main == R else x2d[:n_main]
    xp = x_main.reshape(rows_full, L)             # free when R % k == 0

    w_row = jnp.tile(weight, k).reshape(1, L)
    seg_id = jnp.arange(L, dtype=jnp.int32) // C
    grp_id = jnp.arange(k, dtype=jnp.int32)
    red = (seg_id[:, None] == grp_id[None, :]).astype(jnp.float32)   # (L, k)
    expd = (grp_id[:, None] == seg_id[None, :]).astype(jnp.float32)  # (k, L)

    # Constant blocks (weight + reduce/expand matrices) eat a bit of VMEM.
    const_bytes = (2 * L * k + L) * 4 * 2
    budget = max(2 * 1024 * 1024, tile_budget - const_bytes)
    tm = _pick_row_tile(rows_full, L, itemsize, budget)
    grid = (pl.cdiv(rows_full, tm),)

    out_main = pl.pallas_call(
        functools.partial(_ln_packed_kernel, inv_c=1.0 / C),
        out_shape=jax.ShapeDtypeStruct((rows_full, L), x.dtype),
        grid_spec=pltpu.PrefetchScalarGridSpec(
            num_scalar_prefetch=0,
            grid=grid,
            in_specs=[
                pl.BlockSpec((tm, L), lambda i: (i, 0)),
                pl.BlockSpec((1, L), lambda i: (0, 0)),       # constant block
                pl.BlockSpec((L, k), lambda i: (0, 0)),       # constant block
                pl.BlockSpec((k, L), lambda i: (0, 0)),       # constant block
            ],
            out_specs=pl.BlockSpec((tm, L), lambda i: (i, 0)),
        ),
        compiler_params=compiler_params,
    )(xp, w_row, red, expd)
    out_main = out_main.reshape(n_main, C)

    if n_main == R:
        return out_main.reshape(orig_shape)

    # Tiny tail (< k rows): single-block direct-path call (block == full array).
    x_tail = x2d[n_main:]
    out_tail = _direct_call(x_tail, weight.reshape(1, C),
                            x_tail.shape[0], compiler_params)
    return jnp.concatenate([out_main, out_tail], axis=0).reshape(orig_shape)


# --------------------------------------------------------------------------- #
# Self-test
# --------------------------------------------------------------------------- #
def _ref(x, w):
    sigma = jnp.var(x, axis=-1, keepdims=True)
    return x / jnp.sqrt(sigma + _EPS) * w


if __name__ == "__main__":
    key = jax.random.PRNGKey(0)

    # Shapes consistent with the module's use in CA_S2 (to_3d: (B, H*W, C)).
    B, N, C = 2, 64, 32
    x = jax.random.normal(key, (B, N, C), dtype=jnp.float32)
    weight = jnp.ones((C,), dtype=jnp.float32)       # module init: torch.ones(C)

    y = jax.block_until_ready(biasfree_layernorm(x, weight))
    assert y.shape == x.shape and y.dtype == x.dtype
    assert jnp.allclose(y, _ref(x, weight), atol=1e-5, rtol=1e-5)

    # Direct (lane-dense, C multiple of 128) path.
    C2 = 128
    x2 = jax.random.normal(jax.random.PRNGKey(1), (2, 8, C2), dtype=jnp.float32)
    w2 = jnp.ones((C2,), dtype=jnp.float32)
    y2 = jax.block_until_ready(biasfree_layernorm(x2, w2))
    assert jnp.allclose(y2, _ref(x2, w2), atol=1e-5, rtol=1e-5)

    # Packed path with a ragged tail (R % k != 0): C=48 -> k=8, R=26.
    C3 = 48
    x3 = jax.random.normal(jax.random.PRNGKey(2), (26, C3), dtype=jnp.float32)
    w3 = jax.random.uniform(jax.random.PRNGKey(3), (C3,), dtype=jnp.float32) + 0.5
    y3 = jax.block_until_ready(biasfree_layernorm(x3, w3))
    assert jnp.allclose(y3, _ref(x3, w3), atol=1e-5, rtol=1e-5)

    print("KERNEL_OK")
</pallas_src>

<mosaic_0001>
module attributes {stable_mosaic.version = 11 : i64} {
  func.func @_ln_packed_kernel(%arg0: i32, %arg1: memref<32x128xf32, #tpu.memory_space<vmem>>, %arg2: memref<1x128xf32, #tpu.memory_space<vmem>>, %arg3: memref<128x4xf32, #tpu.memory_space<vmem>>, %arg4: memref<4x128xf32, #tpu.memory_space<vmem>>, %arg5: memref<32x128xf32, #tpu.memory_space<vmem>>) attributes {dimension_semantics = [#tpu.dimension_semantics<parallel>], iteration_bounds = array<i64: 1>, scalar_prefetch = 0 : i64, scratch_operands = 0 : i64, tpu.core_type = #tpu.core_type<tc>, window_params = [{transform_indices = @transform_0, window_bounds = array<i64: 32, 128>}, {pipeline_mode = #tpu.pipeline_mode<synchronous>, transform_indices = @transform_1, window_bounds = array<i64: 1, 128>}, {pipeline_mode = #tpu.pipeline_mode<synchronous>, transform_indices = @transform_2, window_bounds = array<i64: 128, 4>}, {pipeline_mode = #tpu.pipeline_mode<synchronous>, transform_indices = @transform_3, window_bounds = array<i64: 4, 128>}, {transform_indices = @transform_4, window_bounds = array<i64: 32, 128>}]} {
    %c0 = arith.constant 0 : index
    %c0_0 = arith.constant 0 : index
    %0 = vector.load %arg1[%c0, %c0_0] : memref<32x128xf32, #tpu.memory_space<vmem>>, vector<32x128xf32>
    %c0_1 = arith.constant 0 : index
    %c0_2 = arith.constant 0 : index
    %1 = vector.load %arg3[%c0_1, %c0_2] : memref<128x4xf32, #tpu.memory_space<vmem>>, vector<128x4xf32>
    %c0_3 = arith.constant 0 : index
    %c0_4 = arith.constant 0 : index
    %2 = vector.load %arg4[%c0_3, %c0_4] : memref<4x128xf32, #tpu.memory_space<vmem>>, vector<4x128xf32>
    %cst = arith.constant dense<0.000000e+00> : vector<32x4xf32>
    %3 = tpu.matmul %0, %1, %cst {dimension_numbers = #tpu.dot_dimension_numbers<[1], [0], [0], [1], [0, 0, 1, 1], [], []>, precision = #tpu.contract_precision<fp32>} : vector<32x128xf32>, vector<128x4xf32>, vector<32x4xf32> -> vector<32x4xf32>
    %4 = arith.mulf %0, %0 : vector<32x128xf32>
    %cst_5 = arith.constant dense<0.000000e+00> : vector<32x4xf32>
    %5 = tpu.matmul %4, %1, %cst_5 {dimension_numbers = #tpu.dot_dimension_numbers<[1], [0], [0], [1], [0, 0, 1, 1], [], []>, precision = #tpu.contract_precision<fp32>} : vector<32x128xf32>, vector<128x4xf32>, vector<32x4xf32> -> vector<32x4xf32>
    %cst_6 = arith.constant 3.125000e-02 : f32
    %6 = vector.broadcast %cst_6 : f32 to vector<32x4xf32>
    %7 = arith.mulf %3, %6 : vector<32x4xf32>
    %cst_7 = arith.constant 3.125000e-02 : f32
    %8 = vector.broadcast %cst_7 : f32 to vector<32x4xf32>
    %9 = arith.mulf %5, %8 : vector<32x4xf32>
    %10 = arith.mulf %7, %7 : vector<32x4xf32>
    %11 = arith.subf %9, %10 : vector<32x4xf32>
    %cst_8 = arith.constant 9.99999974E-6 : f32
    %12 = vector.broadcast %cst_8 : f32 to vector<32x4xf32>
    %13 = arith.addf %11, %12 : vector<32x4xf32>
    %14 = math.rsqrt %13 : vector<32x4xf32>
    %cst_9 = arith.constant dense<0.000000e+00> : vector<32x128xf32>
    %15 = tpu.matmul %14, %2, %cst_9 {dimension_numbers = #tpu.dot_dimension_numbers<[1], [0], [0], [1], [0, 0, 1, 1], [], []>, precision = #tpu.contract_precision<fp32>} : vector<32x4xf32>, vector<4x128xf32>, vector<32x128xf32> -> vector<32x128xf32>
    %c0_10 = arith.constant 0 : index
    %c0_11 = arith.constant 0 : index
    %16 = vector.load %arg2[%c0_10, %c0_11] : memref<1x128xf32, #tpu.memory_space<vmem>>, vector<1x128xf32>
    %17 = arith.mulf %0, %15 : vector<32x128xf32>
    %18 = vector.broadcast %16 : vector<1x128xf32> to vector<32x128xf32>
    %19 = arith.mulf %17, %18 : vector<32x128xf32>
    %c0_12 = arith.constant 0 : index
    %c0_13 = arith.constant 0 : index
    %20 = vector.load %arg5[%c0_12, %c0_13] : memref<32x128xf32, #tpu.memory_space<vmem>>, vector<32x128xf32>
    tpu.vector_store %arg5[%c0_12, %c0_13], %19 {strides = array<i32>} : memref<32x128xf32, #tpu.memory_space<vmem>>, vector<32x128xf32>,
    return
  }
  func.func @transform_0(%arg0: i32) -> (i32, i32) {
    %c0_i32 = arith.constant 0 : i32
    %c0_i32_0 = arith.constant 0 : i32
    return %arg0, %c0_i32 : i32, i32
  }
  func.func @transform_1(%arg0: i32) -> (i32, i32) {
    %c0_i32 = arith.constant 0 : i32
    %c0_i32_0 = arith.constant 0 : i32
    %c0_i32_1 = arith.constant 0 : i32
    return %c0_i32, %c0_i32_0 : i32, i32
  }
  func.func @transform_2(%arg0: i32) -> (i32, i32) {
    %c0_i32 = arith.constant 0 : i32
    %c0_i32_0 = arith.constant 0 : i32
    %c0_i32_1 = arith.constant 0 : i32
    return %c0_i32, %c0_i32_0 : i32, i32
  }
  func.func @transform_3(%arg0: i32) -> (i32, i32) {
    %c0_i32 = arith.constant 0 : i32
    %c0_i32_0 = arith.constant 0 : i32
    %c0_i32_1 = arith.constant 0 : i32
    return %c0_i32, %c0_i32_0 : i32, i32
  }
  func.func @transform_4(%arg0: i32) -> (i32, i32) {
    %c0_i32 = arith.constant 0 : i32
    %c0_i32_0 = arith.constant 0 : i32
    return %arg0, %c0_i32 : i32, i32
  }
}

</mosaic_0001>

<bundles_post_ra>
// kernel: tpu_custom_call.1
= control target key start
LH: loop header
LB: loop body
LE: loop exit
PB: predicated region body
PF: predicated region fallthrough
CT: control target
= control target key end

     0   :  { %s4150_s0 = inlined_call_operand.vmem [shape: f32[32,128], index: 0, kind: input, shape index: {}]   ;;  %s4151_s1 = inlined_call_operand.vmem [shape: f32[1,128], index: 1, kind: input, shape index: {}]   ;;  %s4152_s2 = inlined_call_operand.vmem [shape: f32[128,4], index: 2, kind: input, shape index: {}]   ;;  %s4153_s3 = inlined_call_operand.vmem [shape: f32[4,128], index: 3, kind: input, shape index: {}]   ;;  %s4154_s4 = inlined_call_operand.hbm [shape: f32[32,128], index: 4, kind: output, shape index: {}]  }
   0x1   :  { %v22_v0 = vld [vmem:[%s4152_s2] sm:$0xff]  ;;  %v23_v1 = vld [vmem:[%s4152_s2 + $0x8] sm:$0xff]  ;;  %v24_v2 = vld [vmem:[%s4152_s2 + $0x10] sm:$0xff] }
   0x2   :  { %v40_v3 = vand.u32 4294901760, %v22_v0  ;;  %v43_v4 = vand.u32 4294901760, %v23_v1  ;;  %v25_v5 = vld [vmem:[%s4152_s2 + $0x18] sm:$0xff]  ;;  %v46_v6 = vand.u32 4294901760, %v24_v2  ;;  %v26_v7 = vld [vmem:[%s4152_s2 + $0x20] sm:$0xff]  ;;  %v27_v8 = vld [vmem:[%s4152_s2 + $0x28] sm:$0xff] }
   0x3   :  { %v49_v9 = vand.u32 4294901760, %v25_v5  ;;  %v52_v10 = vand.u32 4294901760, %v26_v7  ;;  %v55_v11 = vand.u32 4294901760, %v27_v8  ;;  %v28_v12 = vld [vmem:[%s4152_s2 + $0x30] sm:$0xff]  ;;  %v29_v13 = vld [vmem:[%s4152_s2 + $0x38] sm:$0xff]  ;;  %v30_v18 = vld [vmem:[%s4152_s2 + $0x40] sm:$0xff] }
   0x4   :  { %v3540_v14 = vpack.c.bf16 %v43_v4, %v40_v3  ;;  %v3542_v15 = vsub.f32 %v22_v0, %v40_v3  ;;  %v3544_v16 = vsub.f32 %v23_v1, %v43_v4  ;;  %v58_v17 = vand.u32 4294901760, %v28_v12  ;;  %v31_v26 = vld [vmem:[%s4152_s2 + $0x48] sm:$0xff]  ;;  %v32_v27 = vld [vmem:[%s4152_s2 + $0x50] sm:$0xff] }
   0x5   :  { %v3549_v19 = vpack.c.bf16 %v49_v9, %v46_v6  ;;  %v61_v20 = vand.u32 4294901760, %v29_v13  ;;  %v3551_v21 = vsub.f32 %v24_v2, %v46_v6  ;;  %v3554_v22 = vpack.c.bf16 %v55_v11, %v52_v10 }
   0x6   :  { %3010 = vmatprep.subr.bf16.mxu1 %v3540_v14  ;;  %v163_v23 = vand.u32 4294901760, %v3542_v15  ;;  %v170_v24 = vand.u32 4294901760, %v3544_v16  ;;  %v3558_v25 = vsub.f32 %v25_v5, %v49_v9  ;;  %v64_v30 = vand.u32 4294901760, %v30_v18 }
   0x7   :  { %3012 = vmatpush3.bf16.msra.mxu1 %v3540_v14  ;;  %v3567_v28 = vpack.c.bf16 %v61_v20, %v58_v17  ;;  %v177_v29 = vand.u32 4294901760, %v3551_v21  ;;  %v3570_v31 = vsub.f32 %v26_v7, %v52_v10 }
   0x8   :  { %9 = vsyncpa [#allocation3], 0  ;;  %3014 = vmatprep.subr.bf16.mxu1 %v3549_v19  ;;  %v164_v32 = vsub.f32 %v3542_v15, %v163_v23  ;;  %v171_v33 = vsub.f32 %v3544_v16, %v170_v24  ;;  %v184_v34 = vand.u32 4294901760, %v3558_v25  ;;  %v3580_v35 = vsub.f32 %v27_v8, %v55_v11  ;;  %v33_v36 = vld [vmem:[%s4152_s2 + $0x58] sm:$0xff]  ;;  %v34_v55 = vld [vmem:[%s4152_s2 + $0x60] sm:$0xff]  ;;  %s3488_s30 = smov [#allocation2]  }
   0x9   :  { %v178_v37 = vsub.f32 %v3551_v21, %v177_v29  ;;  %v67_v38 = vand.u32 4294901760, %v31_v26  ;;  %v4164_v39 = vand.u32 4294901760, %v3570_v31  ;;  %v70_v40 = vand.u32 4294901760, %v32_v27  ;;  %v35_v61 = vld [vmem:[%s4152_s2 + $0x68] sm:$0xff]  ;;  %v3632_v0 = vld [vmem:[%s4150_s0] sm:$0xff]  ;;  %v36_v9 = vld [vmem:[%s4152_s2 + $0x70] sm:$0xff] }
   0xa   :  { %v165_v41 = vand.u32 4294901760, %v164_v32  ;;  %v172_v42 = vand.u32 4294901760, %v171_v33  ;;  %v185_v43 = vsub.f32 %v3558_v25, %v184_v34  ;;  %v4163_v44 = vand.u32 4294901760, %v3580_v35  ;;  %4171 = vst [vmem:[#allocation5_spill] sm:$0xff] %v3632_v0  ;;  %v3646_v5 = vld [vmem:[%s4150_s0 + $0x8] sm:$0xff]  ;;  %s2223_s5 = sshll.u32 %s3488_s30, 4  ;;  %s2224_s5 = int_to_ptr.vmem [resolvable:$true] %s2223_s5 }
   0xb   :  { %3016 = vmatpush3.bf16.msra.mxu1 %v3549_v19  ;;  %v179_v45 = vand.u32 4294901760, %v178_v37  ;;  %v192_v46 = vsub.f32 %v3570_v31, %v4164_v39  ;;  %v73_v47 = vand.u32 4294901760, %v33_v36  ;;  %v3597_v48 = vsub.f32 %v28_v12, %v58_v17  ;;  %p3469_p1 = scmp.lt.s32.totalorder %s2224_s5, %s2224_s5 }
   0xc   :  { %3018 = vmatprep.subr.bf16.mxu1 %v3554_v22  ;;  %v3600_v49 = vpack.c.bf16 %v172_v42, %v165_v41  ;;  %v186_v50 = vand.u32 4294901760, %v185_v43  ;;  %v199_v51 = vsub.f32 %v3580_v35, %v4163_v44  ;;  %v3605_v52 = vsub.f32 %v29_v13, %v61_v20  ;;  %v37_v13 = vld [vmem:[%s4152_s2 + $0x78] sm:$0xff] }
   0xd   :  { %v193_v53 = vand.u32 4294901760, %v192_v46  ;;  %v4162_v54 = vand.u32 4294901760, %v3597_v48  ;;  %v3614_v57 = vpack.c.bf16 %v67_v38, %v64_v30  ;;  %v3625_v62 = vsub.f32 %v30_v18, %v64_v30 }
   0xe   :  { %3042 = vmatprep.subr.bf16.mxu0 %v3600_v49  ;;  %v3612_v56 = vpack.c.bf16 %v186_v50, %v179_v45  ;;  %v200_v58 = vand.u32 4294901760, %v199_v51  ;;  %v4160_v59 = vand.u32 4294901760, %v3605_v52  ;;  %v3627_v63 = vsub.f32 %v31_v26, %v67_v38 }
   0xf   :  { %3020 = vmatpush3.bf16.msra.mxu1 %v3554_v22  ;;  %3044 = vmatpush3.bf16.msra.mxu0 %v3600_v49  ;;  %v206_v60 = vsub.f32 %v3597_v48, %v4162_v54  ;;  %v3638_v2 = vpack.c.bf16 %v73_v47, %v70_v40  ;;  %v76_v4 = vand.u32 4294901760, %v34_v55  ;;  %v4159_v7 = vand.u32 4294901760, %v3625_v62 }
  0x10   :  { %3022 = vmatprep.subr.bf16.mxu1 %v3567_v28  ;;  %3046 = vmatprep.subr.bf16.mxu0 %v3612_v56  ;;  %v3636_v1 = vpack.c.bf16 %v200_v58, %v193_v53  ;;  %v213_v3 = vsub.f32 %v3605_v52, %v4160_v59  ;;  %v4158_v8 = vand.u32 4294901760, %v3627_v63  ;;  %v3653_v10 = vsub.f32 %v32_v27, %v70_v40 }
  0x11   :  { %v207_v6 = vand.u32 4294901760, %v206_v60  ;;  %v79_v12 = vand.u32 4294901760, %v35_v61  ;;  %v3658_v17 = vsub.f32 %v33_v36, %v73_v47  ;;  %v3661_v18 = vand.u32 4294901760, %v3632_v0 }
  0x12   :  { %v214_v11 = vand.u32 4294901760, %v213_v3  ;;  %v220_v20 = vsub.f32 %v3625_v62, %v4159_v7  ;;  %v227_v26 = vsub.f32 %v3627_v63, %v4158_v8  ;;  %v4157_v27 = vand.u32 4294901760, %v3653_v10 }
  0x13   :  { %4172 = vst [vmem:[#allocation6_spill] sm:$0xff] %v3661_v18  ;;  %3024 = vmatpush3.bf16.msra.mxu1 %v3567_v28  ;;  %3048 = vmatpush3.bf16.msra.mxu0 %v3612_v56  ;;  %v3673_v30 = vand.u32 4294901760, %v3646_v5  ;;  %v82_v33 = vand.u32 4294901760, %v36_v9  ;;  %v4156_v36 = vand.u32 4294901760, %v3658_v17  ;;  %v3682_v37 = vsub.f32 %v3632_v0, %v3661_v18 }
  0x14   :  { %3026 = vmatprep.subr.bf16.mxu1 %v3614_v57  ;;  %3050 = vmatprep.subr.bf16.mxu0 %v3636_v1  ;;  %v3677_v32 = vpack.c.bf16 %v214_v11, %v207_v6  ;;  %v221_v38 = vand.u32 4294901760, %v220_v20  ;;  %v228_v40 = vand.u32 4294901760, %v227_v26  ;;  %v85_v41 = vand.u32 4294901760, %v37_v13 }
  0x15   :  { %v234_v42 = vsub.f32 %v3653_v10, %v4157_v27  ;;  %2575 = vmatprep.mubr.f32.mxu0 %v3661_v18  ;;  %v241_v43 = vsub.f32 %v3658_v17, %v4156_v36  ;;  %v4155_v45 = vand.u32 4294901760, %v3682_v37  ;;  %v3694_v46 = vsub.f32 %v3646_v5, %v3673_v30 }
  0x16   :  { %v3696_v47 = vsub.f32 %v34_v55, %v76_v4  ;;  %v3700_v50 = vpack.c.bf16 %v79_v12, %v76_v4  ;;  %v3702_v51 = vpack.c.bf16 %v228_v40, %v221_v38  ;;  %v3704_v58 = vsub.f32 %v35_v61, %v79_v12  ;;  %v3723_v38 = vld [vmem:[%s4150_s0 + $0x10] sm:$0xff]  ;;  %v3732_v40 = vld [vmem:[%s4150_s0 + $0x18] sm:$0xff] }
  0x17   :  { %3028 = vmatpush3.bf16.msra.mxu1 %v3614_v57  ;;  %3052 = vmatpush3.bf16.msra.mxu0 %v3636_v1  ;;  %v235_v53 = vand.u32 4294901760, %v234_v42  ;;  %v242_v60 = vand.u32 4294901760, %v241_v43  ;;  %v123_v55 = vsub.f32 %v3682_v37, %v4155_v45  ;;  %v3712_v6 = vsub.f32 %v36_v9, %v82_v33 }
  0x18   :  { %3030 = vmatprep.subr.bf16.mxu1 %v3638_v2  ;;  %3054 = vmatprep.subr.bf16.mxu0 %v3677_v32  ;;  %v247_v3 = vand.u32 4294901760, %v3696_v47  ;;  %v254_v4 = vand.u32 4294901760, %v3704_v58  ;;  %v3715_v11 = vsub.f32 %v37_v13, %v85_v41  ;;  %v4161_v61 = vand.u32 4294901760, %v3694_v46 }
  0x19   :  { %v124_v20 = vand.u32 4294901760, %v123_v55  ;;  %v261_v26 = vand.u32 4294901760, %v3712_v6  ;;  %v3736_v42 = vpack.c.bf16 %v85_v41, %v82_v33  ;;  %v3738_v43 = vpack.c.bf16 %v242_v60, %v235_v53 }
  0x1a   :  { %v248_v12 = vsub.f32 %v3696_v47, %v247_v3  ;;  %v255_v9 = vsub.f32 %v3704_v58, %v254_v4  ;;  %v268_v13 = vand.u32 4294901760, %v3715_v11  ;;  %v3743_v8 = vand.u32 4294901760, %v3723_v38 }
  0x1b   :  { %3032 = vmatpush3.bf16.msra.mxu1 %v3638_v2  ;;  %3056 = vmatpush3.bf16.msra.mxu0 %v3677_v32  ;;  %v262_v45 = vsub.f32 %v3712_v6, %v261_v26  ;;  %v133_v7 = vsub.f32 %v3694_v46, %v4161_v61  ;;  %v3749_v59 = vand.u32 4294901760, %v3732_v40  ;;  %v809_v41 = vmul.f32 %v3632_v0, %v3632_v0 }
  0x1c   :  { %3034 = vmatprep.subr.bf16.mxu1 %v3700_v50  ;;  %3058 = vmatprep.subr.bf16.mxu0 %v3702_v51  ;;  %v249_v55 = vand.u32 4294901760, %v248_v12  ;;  %v256_v36 = vand.u32 4294901760, %v255_v9  ;;  %v269_v27 = vsub.f32 %v3715_v11, %v268_v13  ;;  %v3755_v33 = vsub.f32 %v3723_v38, %v3743_v8 }
  0x1d   :  { %2537 = vmatprep.mubr.f32.mxu1 %v124_v20  ;;  %v263_v60 = vand.u32 4294901760, %v262_v45  ;;  %v3765_v12 = vsub.f32 %v3732_v40, %v3749_v59  ;;  %v3768_v61 = vand.u32 4294901760, %v809_v41  ;;  %v134_v54 = vand.u32 4294901760, %v133_v7 }
  0x1e   :  { %v3761_v53 = vpack.c.bf16 %v256_v36, %v249_v55  ;;  %v270_v20 = vand.u32 4294901760, %v269_v27  ;;  %v4165_v9 = vand.u32 4294901760, %v3755_v33  ;;  %v3775_v39 = vpack.c.bf16 %v170_v24, %v163_v23 }
  0x1f   :  { %3036 = vmatpush3.bf16.msra.mxu1 %v3700_v50  ;;  %3060 = vmatpush3.bf16.msra.mxu0 %v3702_v51  ;;  %v4169_v44 = vand.u32 4294901760, %v3765_v12  ;;  %v3783_v36 = vsub.f32 %v809_v41, %v3768_v61  ;;  %v3789_v7 = vpack.c.bf16 %v184_v34, %v177_v29  ;;  %v4174_v45 = vand.u32 4294901760, %v3570_v31 }
  0x20   :  { %3038 = vmatprep.subr.bf16.mxu1 %v3736_v42  ;;  %3062 = vmatprep.subr.bf16.mxu0 %v3738_v43  ;;  %v143_v27 = vsub.f32 %v3755_v33, %v4165_v9  ;;  %v3793_v23 = vpack.c.bf16 %v270_v20, %v263_v60  ;;  %v4175_v55 = vand.u32 4294901760, %v3580_v35  ;;  %v4176_v34 = vand.u32 4294901760, %v3597_v48 }
  0x21   :  { %4173 = vst [vmem:[#allocation7_spill] sm:$0xff] %v3789_v7  ;;  %v153_v24 = vsub.f32 %v3765_v12, %v4169_v44  ;;  %v896_v29 = vand.u32 4294901760, %v3783_v36  ;;  %v4177_v0 = vand.u32 4294901760, %v3605_v52  ;;  %v4178_v20 = vand.u32 4294901760, %v3625_v62 }
  0x22   :  { %v3802_v41 = vpack.c.bf16 %v4175_v55, %v4174_v45  ;;  %v144_v9 = vand.u32 4294901760, %v143_v27  ;;  %v4179_v44 = vand.u32 4294901760, %v3627_v63  ;;  %v4180_v45 = vand.u32 4294901760, %v3653_v10 }
  0x23   :  { %3040 = vmatpush3.bf16.msra.mxu1 %v3736_v42  ;;  %3064 = vmatpush3.bf16.msra.mxu0 %v3738_v43  ;;  %v3809_v18 = vpack.c.bf16 %v4177_v0, %v4176_v34  ;;  %v154_v60 = vand.u32 4294901760, %v153_v24  ;;  %v897_v27 = vsub.f32 %v3783_v36, %v896_v29  ;;  %v4181_v0 = vand.u32 4294901760, %v3658_v17 }
  0x24   :  { %3066 = vmatprep.subr.bf16.mxu0 %v3761_v53  ;;  %3202 = vmatprep.subr.bf16.mxu1 %v3540_v14  ;;  %v3815_v7 = vpack.c.bf16 %v4179_v44, %v4178_v20  ;;  %v3828_v24 = vpack.c.bf16 %v254_v4, %v247_v3  ;;  %v3834_v44 = vpack.c.bf16 %v3544_v16, %v3542_v15  ;;  %vm1620_vm0 = vcmask 1043456  }
  0x25   :  { %v3836_v55 = vpack.c.bf16 %v268_v13, %v261_v26  ;;  %v898_v34 = vand.u32 4294901760, %v897_v27  ;;  %v3844_v3 = vpack.c.bf16 %v3558_v25, %v3551_v21  ;;  %v810_v15 = vmul.f32 %v3646_v5, %v3646_v5 }
  0x26   :  { %2538 = vmatmul.mubr.f32.vlgmr.msra.gmra.mrb[0].mxu1 %v134_v54  ;;  %v3826_v54 = vpack.c.bf16 %v4181_v0, %v4180_v45  ;;  %v3855_v16 = vpack.c.bf16 %v3580_v35, %v3570_v31  ;;  %v811_v21 = vmul.f32 %v3723_v38, %v3723_v38  ;;  %v812_v4 = vmul.f32 %v3732_v40, %v3732_v40 }
  0x27   :  { %3068 = vmatpush3.bf16.msra.mxu0 %v3761_v53  ;;  %3204 = vmatpush3.bf16.msra.mxu1 %v3540_v14  ;;  %v3860_v25 = vand.u32 4294901760, %v810_v15  ;;  %v3871_v31 = vpack.c.bf16 %v3605_v52, %v3597_v48  ;;  %v3887_v48 = vpack.c.bf16 %v3627_v63, %v3625_v62  ;;  %v3902_v62 = vpack.c.bf16 %v3658_v17, %v3653_v10 }
  0x28   :  { %3070 = vmatprep.subr.bf16.mxu0 %v3793_v23  ;;  %3206 = vmatprep.subr.bf16.mxu1 %v3549_v19  ;;  %v3874_v35 = vand.u32 4294901760, %v811_v21  ;;  %v3879_v13 = vand.u32 4294901760, %v812_v4  ;;  %v3915_v10 = vpack.c.bf16 %v3704_v58, %v3696_v47  ;;  %v3929_v47 = vpack.c.bf16 %v3715_v11, %v3712_v6 }
  0x29   :  { %2540 = vmatprep.mubr.f32.mxu1 %v144_v9  ;;  %v3877_v26 = vsub.f32 %v810_v15, %v3860_v25  ;;  %vm1607_vm1 = vcmask 31744  }
  0x2a   :  { %2541 = vmatmul.mubr.f32.gmra.mrb[2].mxu1 %v154_v60  ;;  %v3890_v52 = vsub.f32 %v811_v21, %v3874_v35  ;;  %v3894_v60 = vsub.f32 %v812_v4, %v3879_v13 }
  0x2b   :  { %3072 = vmatpush3.bf16.msra.mxu0 %v3793_v23  ;;  %3208 = vmatpush3.bf16.msra.mxu1 %v3549_v19  ;;  %v906_v9 = vand.u32 4294901760, %v3877_v26 }
  0x2c   :  { %3074 = vmatprep.subr.bf16.mxu0 %v3834_v44  ;;  %3210 = vmatprep.subr.bf16.mxu1 %v3554_v22  ;;  %v916_v63 = vand.u32 4294901760, %v3890_v52  ;;  %v926_v27 = vand.u32 4294901760, %v3894_v60 }
  0x2d   :  { %2765 = vmatprep.mubr.f32.mxu1 %v898_v34  ;;  %v907_v20 = vsub.f32 %v3877_v26, %v906_v9 }
  0x2e   :  { %2576 = vmatmul.mubr.f32.vlgmr.msra.gmra.mrb[0].mxu0 %v3673_v30  ;;  %v917_v17 = vsub.f32 %v3890_v52, %v916_v63  ;;  %v927_v0 = vsub.f32 %v3894_v60, %v926_v27 }
  0x2f   :  { %3076 = vmatpush3.bf16.msra.mxu0 %v3834_v44  ;;  %3212 = vmatpush3.bf16.msra.mxu1 %v3554_v22  ;;  %v908_v45 = vand.u32 4294901760, %v907_v20 }
  0x30   :  { %3078 = vmatprep.subr.bf16.mxu0 %v3844_v3  ;;  %3214 = vmatprep.subr.bf16.mxu1 %v3567_v28  ;;  %v918_v58 = vand.u32 4294901760, %v917_v17  ;;  %v928_v34 = vand.u32 4294901760, %v927_v0 }
  0x31   :  { %2578 = vmatprep.mubr.f32.mxu0 %v3743_v8 }
  0x32   :  { %2579 = vmatmul.mubr.f32.gmra.mrb[2].mxu0 %v3749_v59 }
  0x33   :  { %3080 = vmatpush3.bf16.msra.mxu0 %v3844_v3  ;;  %3216 = vmatpush3.bf16.msra.mxu1 %v3567_v28 }
  0x34   :  { %3082 = vmatprep.subr.bf16.mxu0 %v3855_v16  ;;  %3218 = vmatprep.subr.bf16.mxu1 %v3614_v57 }
  0x35   :  { %2613 = vmatprep.mubr.f32.mxu0 %v3682_v37 }
  0x37   :  { %3084 = vmatpush3.bf16.msra.mxu0 %v3855_v16  ;;  %3220 = vmatpush3.bf16.msra.mxu1 %v3614_v57 }
  0x38   :  { %3086 = vmatprep.subr.bf16.mxu0 %v3871_v31  ;;  %3222 = vmatprep.subr.bf16.mxu1 %v3638_v2 }
  0x3b   :  { %3088 = vmatpush3.bf16.msra.mxu0 %v3871_v31  ;;  %3224 = vmatpush3.bf16.msra.mxu1 %v3638_v2 }
  0x3c   :  { %3090 = vmatprep.subr.bf16.mxu0 %v3887_v48  ;;  %3226 = vmatprep.subr.bf16.mxu1 %v3700_v50 }
  0x3f   :  { %3092 = vmatpush3.bf16.msra.mxu0 %v3887_v48  ;;  %3228 = vmatpush3.bf16.msra.mxu1 %v3700_v50 }
  0x40   :  { %3094 = vmatprep.subr.bf16.mxu0 %v3902_v62  ;;  %3230 = vmatprep.subr.bf16.mxu1 %v3736_v42 }
  0x43   :  { %3096 = vmatpush3.bf16.msra.mxu0 %v3902_v62  ;;  %3232 = vmatpush3.bf16.msra.mxu1 %v3736_v42 }
  0x44   :  { %3098 = vmatprep.subr.bf16.mxu0 %v3915_v10  ;;  %3234 = vmatprep.subr.bf16.mxu1 %v3600_v49 }
  0x46   :  { %2766 = vmatmul.mubr.f32.vlgmr.msra.gmra.mrb[4].mxu1 %v908_v45 }
  0x47   :  { %3100 = vmatpush3.bf16.msra.mxu0 %v3915_v10  ;;  %3236 = vmatpush3.bf16.msra.mxu1 %v3600_v49  ;;  %v4182_v49 = vand.u32 4294901760, %v3682_v37  ;;  %v4186_v37 = vand.u32 4294901760, %v3765_v12 }
  0x48   :  { %3102 = vmatprep.subr.bf16.mxu0 %v3929_v47  ;;  %3238 = vmatprep.subr.bf16.mxu1 %v3612_v56 }
  0x49   :  { %2768 = vmatprep.mubr.f32.mxu1 %v918_v58 }
  0x4a   :  { %2769 = vmatmul.mubr.f32.gmra.mrb[6].mxu1 %v928_v34 }
  0x4b   :  { %3104 = vmatpush3.bf16.msra.mxu0 %v3929_v47  ;;  %3240 = vmatpush3.bf16.msra.mxu1 %v3612_v56  ;;  %v4183_v56 = vand.u32 4294901760, %v3694_v46 }
  0x4c   :  { %3106 = vmatprep.subr.bf16.mxu0 %v3540_v14  ;;  %3242 = vmatprep.subr.bf16.mxu1 %v3636_v1 }
  0x4d   :  { %2803 = vmatprep.mubr.f32.mxu1 %v3768_v61 }
  0x4e   :  { %2614 = vmatmul.mubr.f32.vlgmr.msra.gmra.mrb[0].mxu0 %v3694_v46  ;;  %v4187_v46 = vld [vmem:[#allocation6_spill] sm:$0xff] }
  0x4f   :  { %3108 = vmatpush3.bf16.msra.mxu0 %v3540_v14  ;;  %3244 = vmatpush3.bf16.msra.mxu1 %v3636_v1  ;;  %v4184_v1 = vld [vmem:[#allocation7_spill] sm:$0xff] }
  0x50   :  { %3110 = vmatprep.subr.bf16.mxu0 %v3549_v19  ;;  %3246 = vmatprep.subr.bf16.mxu1 %v3677_v32 }
  0x51   :  { %2616 = vmatprep.mubr.f32.mxu0 %v3755_v33 }
  0x52   :  { %2617 = vmatmul.mubr.f32.gmra.mrb[2].mxu0 %v3765_v12 }
  0x53   :  { %3112 = vmatpush3.bf16.msra.mxu0 %v3549_v19  ;;  %3248 = vmatpush3.bf16.msra.mxu1 %v3677_v32  ;;  %v4185_v32 = vand.u32 4294901760, %v3755_v33 }
  0x54   :  { %3114 = vmatprep.subr.bf16.mxu0 %v3554_v22  ;;  %3250 = vmatprep.subr.bf16.mxu1 %v3702_v51 }
  0x55   :  { %2651 = vmatprep.mubr.f32.mxu0 %v4182_v49 }
  0x57   :  { %3116 = vmatpush3.bf16.msra.mxu0 %v3554_v22  ;;  %3252 = vmatpush3.bf16.msra.mxu1 %v3702_v51 }
  0x58   :  { %3118 = vmatprep.subr.bf16.mxu0 %v3567_v28  ;;  %3254 = vmatprep.subr.bf16.mxu1 %v3738_v43 }
  0x5b   :  { %3120 = vmatpush3.bf16.msra.mxu0 %v3567_v28  ;;  %3256 = vmatpush3.bf16.msra.mxu1 %v3738_v43 }
  0x5c   :  { %3122 = vmatprep.subr.bf16.mxu0 %v3614_v57  ;;  %3258 = vmatprep.subr.bf16.mxu1 %v3761_v53 }
  0x5f   :  { %3124 = vmatpush3.bf16.msra.mxu0 %v3614_v57  ;;  %3260 = vmatpush3.bf16.msra.mxu1 %v3761_v53 }
  0x60   :  { %3126 = vmatprep.subr.bf16.mxu0 %v3638_v2  ;;  %3262 = vmatprep.subr.bf16.mxu1 %v3793_v23 }
  0x63   :  { %3128 = vmatpush3.bf16.msra.mxu0 %v3638_v2  ;;  %3264 = vmatpush3.bf16.msra.mxu1 %v3793_v23 }
  0x64   :  { %3130 = vmatprep.subr.bf16.mxu0 %v3700_v50  ;;  %3266 = vmatprep.subr.bf16.mxu1 %v3834_v44 }
  0x66   :  { %2804 = vmatmul.mubr.f32.vlgmr.msra.gmra.mrb[4].mxu1 %v3860_v25 }
  0x67   :  { %3132 = vmatpush3.bf16.msra.mxu0 %v3700_v50  ;;  %3268 = vmatpush3.bf16.msra.mxu1 %v3834_v44 }
  0x68   :  { %3134 = vmatprep.subr.bf16.mxu0 %v3736_v42  ;;  %3270 = vmatprep.subr.bf16.mxu1 %v3844_v3 }
  0x69   :  { %2806 = vmatprep.mubr.f32.mxu1 %v3874_v35 }
  0x6a   :  { %2807 = vmatmul.mubr.f32.gmra.mrb[6].mxu1 %v3879_v13 }
  0x6b   :  { %3136 = vmatpush3.bf16.msra.mxu0 %v3736_v42  ;;  %3272 = vmatpush3.bf16.msra.mxu1 %v3844_v3 }
  0x6c   :  { %3138 = vmatprep.subr.bf16.mxu0 %v3775_v39  ;;  %3274 = vmatprep.subr.bf16.mxu1 %v3855_v16 }
  0x6d   :  { %2841 = vmatprep.mubr.f32.mxu1 %v3783_v36 }
  0x6e   :  { %2652 = vmatmul.mubr.f32.vlgmr.msra.gmra.mrb[0].mxu0 %v4183_v56 }
  0x6f   :  { %3140 = vmatpush3.bf16.msra.mxu0 %v3775_v39  ;;  %3276 = vmatpush3.bf16.msra.mxu1 %v3855_v16 }
  0x70   :  { %3142 = vmatprep.subr.bf16.mxu0 %v4184_v1  ;;  %3278 = vmatprep.subr.bf16.mxu1 %v3871_v31 }
  0x71   :  { %2654 = vmatprep.mubr.f32.mxu0 %v4185_v32 }
  0x72   :  { %2655 = vmatmul.mubr.f32.gmra.mrb[2].mxu0 %v4186_v37 }
  0x73   :  { %3144 = vmatpush3.bf16.msra.mxu0 %v4184_v1  ;;  %3280 = vmatpush3.bf16.msra.mxu1 %v3871_v31 }
  0x74   :  { %3146 = vmatprep.subr.bf16.mxu0 %v3802_v41  ;;  %3282 = vmatprep.subr.bf16.mxu1 %v3887_v48 }
  0x75   :  { %2689 = vmatprep.mubr.f32.mxu0 %v4187_v46 }
  0x77   :  { %3148 = vmatpush3.bf16.msra.mxu0 %v3802_v41  ;;  %3284 = vmatpush3.bf16.msra.mxu1 %v3887_v48 }
  0x78   :  { %3150 = vmatprep.subr.bf16.mxu0 %v3809_v18  ;;  %3286 = vmatprep.subr.bf16.mxu1 %v3902_v62 }
  0x7b   :  { %3152 = vmatpush3.bf16.msra.mxu0 %v3809_v18  ;;  %3288 = vmatpush3.bf16.msra.mxu1 %v3902_v62 }
  0x7c   :  { %3154 = vmatprep.subr.bf16.mxu0 %v3815_v7  ;;  %3290 = vmatprep.subr.bf16.mxu1 %v3915_v10 }
  0x7f   :  { %3156 = vmatpush3.bf16.msra.mxu0 %v3815_v7  ;;  %3292 = vmatpush3.bf16.msra.mxu1 %v3915_v10 }
  0x80   :  { %3158 = vmatprep.subr.bf16.mxu0 %v3826_v54  ;;  %3294 = vmatprep.subr.bf16.mxu1 %v3929_v47 }
  0x83   :  { %3160 = vmatpush3.bf16.msra.mxu0 %v3826_v54  ;;  %3296 = vmatpush3.bf16.msra.mxu1 %v3929_v47 }
  0x84   :  { %3162 = vmatprep.subr.bf16.mxu0 %v3828_v24  ;;  %3298 = vmatprep.subr.bf16.mxu1 %v3540_v14 }
  0x86   :  { %2842 = vmatmul.mubr.f32.vlgmr.msra.gmra.mrb[4].mxu1 %v3877_v26 }
  0x87   :  { %3164 = vmatpush3.bf16.msra.mxu0 %v3828_v24  ;;  %3300 = vmatpush3.bf16.msra.mxu1 %v3540_v14 }
  0x88   :  { %3166 = vmatprep.subr.bf16.mxu0 %v3836_v55  ;;  %3302 = vmatprep.subr.bf16.mxu1 %v3549_v19 }
  0x89   :  { %2844 = vmatprep.mubr.f32.mxu1 %v3890_v52 }
  0x8a   :  { %2845 = vmatmul.mubr.f32.gmra.mrb[6].mxu1 %v3894_v60 }
  0x8b   :  { %3168 = vmatpush3.bf16.msra.mxu0 %v3836_v55  ;;  %3304 = vmatpush3.bf16.msra.mxu1 %v3549_v19 }
  0x8c   :  { %3170 = vmatprep.subr.bf16.mxu0 %v3540_v14  ;;  %3306 = vmatprep.subr.bf16.mxu1 %v3554_v22 }
  0x8d   :  { %2879 = vmatprep.mubr.f32.mxu1 %v896_v29 }
  0x8e   :  { %2690 = vmatmul.mubr.f32.vlgmr.msra.gmra.mrb[0].mxu0 %v3673_v30 }
  0x8f   :  { %3172 = vmatpush3.bf16.msra.mxu0 %v3540_v14  ;;  %3308 = vmatpush3.bf16.msra.mxu1 %v3554_v22 }
  0x90   :  { %3174 = vmatprep.subr.bf16.mxu0 %v3549_v19  ;;  %3310 = vmatprep.subr.bf16.mxu1 %v3567_v28 }
  0x91   :  { %2692 = vmatprep.mubr.f32.mxu0 %v3743_v8 }
  0x92   :  { %2693 = vmatmul.mubr.f32.gmra.mrb[2].mxu0 %v3749_v59 }
  0x93   :  { %3176 = vmatpush3.bf16.msra.mxu0 %v3549_v19  ;;  %3312 = vmatpush3.bf16.msra.mxu1 %v3567_v28 }
  0x94   :  { %3178 = vmatprep.subr.bf16.mxu0 %v3554_v22  ;;  %3314 = vmatprep.subr.bf16.mxu1 %v3614_v57 }
  0x95   :  { %2727 = vmatprep.mubr.f32.mxu0 %v4187_v46 }
  0x97   :  { %3180 = vmatpush3.bf16.msra.mxu0 %v3554_v22  ;;  %3316 = vmatpush3.bf16.msra.mxu1 %v3614_v57 }
  0x98   :  { %3182 = vmatprep.subr.bf16.mxu0 %v3567_v28  ;;  %3318 = vmatprep.subr.bf16.mxu1 %v3638_v2 }
  0x9b   :  { %3184 = vmatpush3.bf16.msra.mxu0 %v3567_v28  ;;  %3320 = vmatpush3.bf16.msra.mxu1 %v3638_v2 }
  0x9c   :  { %3186 = vmatprep.subr.bf16.mxu0 %v3614_v57  ;;  %3322 = vmatprep.subr.bf16.mxu1 %v3700_v50 }
  0x9f   :  { %3188 = vmatpush3.bf16.msra.mxu0 %v3614_v57  ;;  %3324 = vmatpush3.bf16.msra.mxu1 %v3700_v50 }
  0xa0   :  { %3190 = vmatprep.subr.bf16.mxu0 %v3638_v2  ;;  %3326 = vmatprep.subr.bf16.mxu1 %v3736_v42 }
  0xa3   :  { %3192 = vmatpush3.bf16.msra.mxu0 %v3638_v2  ;;  %3328 = vmatpush3.bf16.msra.mxu1 %v3736_v42 }
  0xa4   :  { %3194 = vmatprep.subr.bf16.mxu0 %v3700_v50  ;;  %3330 = vmatprep.subr.bf16.mxu1 %v3775_v39 }
  0xa6   :  { %2880 = vmatmul.mubr.f32.vlgmr.msra.gmra.mrb[4].mxu1 %v906_v9 }
  0xa7   :  { %3196 = vmatpush3.bf16.msra.mxu0 %v3700_v50  ;;  %3332 = vmatpush3.bf16.msra.mxu1 %v3775_v39  ;;  %v38_v39 = vld [vmem:[%s4153_s3] sm:$0xf] }
  0xa8   :  { %3198 = vmatprep.subr.bf16.mxu0 %v3736_v42  ;;  %3334 = vmatprep.subr.bf16.mxu1 %v4184_v1 }
  0xa9   :  { %2882 = vmatprep.mubr.f32.mxu1 %v916_v63 }
  0xaa   :  { %2883 = vmatmul.mubr.f32.gmra.mrb[6].mxu1 %v926_v27 }
  0xab   :  { %3200 = vmatpush3.bf16.msra.mxu0 %v3736_v42  ;;  %3336 = vmatpush3.bf16.msra.mxu1 %v4184_v1 }
  0xac   :  { %3338 = vmatprep.subr.bf16.mxu1 %v3802_v41  ;;  %2917 = vmatprep.mubr.f32.mxu1 %v3768_v61 }
  0xae   :  { %2728 = vmatmul.mubr.f32.vlgmr.msra.gmra.mrb[0].mxu0 %v3673_v30 }
  0xaf   :  { %3340 = vmatpush3.bf16.msra.mxu1 %v3802_v41  ;;  %2730 = vmatprep.mubr.f32.mxu0 %v3743_v8 }
  0xb0   :  { %3342 = vmatprep.subr.bf16.mxu1 %v3809_v18 }
  0xb2   :  { %2731 = vmatmul.mubr.f32.gmra.mrb[2].mxu0 %v3749_v59 }
  0xb3   :  { %3344 = vmatpush3.bf16.msra.mxu1 %v3809_v18 }
  0xb4   :  { %3346 = vmatprep.subr.bf16.mxu1 %v3815_v7 }
  0xb7   :  { %3348 = vmatpush3.bf16.msra.mxu1 %v3815_v7 }
  0xb8   :  { %3350 = vmatprep.subr.bf16.mxu1 %v3826_v54 }
  0xbb   :  { %3352 = vmatpush3.bf16.msra.mxu1 %v3826_v54 }
  0xbc   :  { %3354 = vmatprep.subr.bf16.mxu1 %v3828_v24 }
  0xbf   :  { %3356 = vmatpush3.bf16.msra.mxu1 %v3828_v24 }
  0xc0   :  { %3358 = vmatprep.subr.bf16.mxu1 %v3836_v55 }
  0xc3   :  { %3360 = vmatpush3.bf16.msra.mxu1 %v3836_v55 }
  0xc4   :  { %3362 = vmatprep.subr.bf16.mxu1 %v3540_v14 }
  0xc6   :  { %2918 = vmatmul.mubr.f32.vlgmr.msra.gmra.mrb[4].mxu1 %v3860_v25 }
  0xc7   :  { %3364 = vmatpush3.bf16.msra.mxu1 %v3540_v14  ;;  %2920 = vmatprep.mubr.f32.mxu1 %v3874_v35 }
  0xc8   :  { %3366 = vmatprep.subr.bf16.mxu1 %v3549_v19 }
  0xca   :  { %2921 = vmatmul.mubr.f32.gmra.mrb[6].mxu1 %v3879_v13 }
  0xcb   :  { %3368 = vmatpush3.bf16.msra.mxu1 %v3549_v19  ;;  %2955 = vmatprep.mubr.f32.mxu1 %v3768_v61 }
  0xcc   :  { %3370 = vmatprep.subr.bf16.mxu1 %v3554_v22 }
  0xcf   :  { %3372 = vmatpush3.bf16.msra.mxu1 %v3554_v22 }
  0xd0   :  { %3374 = vmatprep.subr.bf16.mxu1 %v3567_v28 }
  0xd3   :  { %3376 = vmatpush3.bf16.msra.mxu1 %v3567_v28 }
  0xd4   :  { %3378 = vmatprep.subr.bf16.mxu1 %v3614_v57 }
  0xd7   :  { %3380 = vmatpush3.bf16.msra.mxu1 %v3614_v57  ;;  %v1622_v57 = vsel %vm1620_vm0, %v38_v39, 0 }
  0xd8   :  { %3382 = vmatprep.subr.bf16.mxu1 %v3638_v2  ;;  %v4107_v59 = vand.u32 4294901760, %v1622_v57 }
  0xda   :  { %2961 = vmatprep.subr.mxu0 %v4107_v59 }
  0xdb   :  { %3384 = vmatpush3.bf16.msra.mxu1 %v3638_v2  ;;  %2962 = vmatpush3.msra.mxu0 %v4107_v59  ;;  %v4112_v2 = vsub.f32 %v1622_v57, %v4107_v59 }
  0xdc   :  { %3386 = vmatprep.subr.bf16.mxu1 %v3700_v50 }
  0xdd   :  { %v4115_v8 = vand.u32 4294901760, %v4112_v2 }
  0xdf   :  { %3388 = vmatpush3.bf16.msra.mxu1 %v3700_v50  ;;  %v1734_v18 = vsub.f32 %v4112_v2, %v4115_v8 }
  0xe0   :  { %3390 = vmatprep.subr.bf16.mxu1 %v3736_v42 }
  0xe1   :  { %v4119_v30 = vand.u32 4294901760, %v1734_v18 }
  0xe3   :  { %3392 = vmatpush3.bf16.msra.mxu1 %v3736_v42  ;;  %2969 = vmatprep.subr.mxu0 %v4119_v30 }
  0xe6   :  { %2956 = vmatmul.mubr.f32.vlgmr.msra.gmra.mrb[4].mxu1 %v3860_v25 }
  0xe7   :  { %2958 = vmatprep.mubr.f32.mxu1 %v3874_v35 }
  0xea   :  { %2959 = vmatmul.mubr.f32.gmra.mrb[6].mxu1 %v3879_v13 }
  0xf9   :  { %v2539_v14 = vpop.f32.mrb[0].mxu1 }
  0xfa   :  { %v126_v19 = vpop.f32.mrb[1].mxu1 }
  0xfd   :  { %v2542_v22 = vpop.f32.mrb[2].mxu1 }
  0xfe   :  { %v146_v28 = vpop.f32.mrb[3].mxu1 }
 0x181   :  { %v2729_v50 = vpop.f32.mrb[0].mxu0 }
 0x182   :  { %v3393_v51 = vadd.f32 %v2729_v50, %v2539_v14  ;;  %v787_v6 = vpop.f32.mrb[1].mxu0 }
 0x183   :  { %v3394_v11 = vadd.f32 %v787_v6, %v126_v19 }
 0x184   :  { %v1584_v53 = vmul.f32 0.03125, %v3393_v51 }
 0x185   :  { %v2732_v61 = vpop.f32.mrb[2].mxu0  ;;  %v1583_v12 = vmul.f32 0.03125, %v3394_v11 }
 0x186   :  { %v3395_v42 = vadd.f32 %v2732_v61, %v2542_v22  ;;  %v799_v43 = vpop.f32.mrb[3].mxu0  ;;  %v1592_v7 = vmul.f32 %v1584_v53, %v1584_v53  ;;  %v4188_v61 = vld [vmem:[#allocation5_spill] sm:$0xff] }
 0x187   :  { %v3396_v33 = vadd.f32 %v799_v43, %v146_v28  ;;  %v1591_v54 = vmul.f32 %v1583_v12, %v1583_v12 }
 0x188   :  { %v1586_v23 = vmul.f32 0.03125, %v3395_v42 }
 0x189   :  { %v1585_v24 = vmul.f32 0.03125, %v3396_v33 }
 0x18a   :  { %v1594_v16 = vmul.f32 %v1586_v23, %v1586_v23 }
 0x18b   :  { %v1593_v31 = vmul.f32 %v1585_v24, %v1585_v24 }
 0x1b9   :  { %v2957_v36 = vpop.f32.mrb[4].mxu1 }
 0x1ba   :  { %v1588_v41 = vmul.f32 0.03125, %v2957_v36  ;;  %v1561_v29 = vpop.f32.mrb[5].mxu1 }
 0x1bb   :  { %v1587_v44 = vmul.f32 0.03125, %v1561_v29 }
 0x1bc   :  { %v1596_v55 = vsub.f32 %v1588_v41, %v1592_v7 }
 0x1bd   :  { %v1595_v3 = vsub.f32 %v1587_v44, %v1591_v54  ;;  %v2960_v15 = vpop.f32.mrb[6].mxu1 }
 0x1be   :  { %v1600_v21 = vadd.f32 1e-05, %v1596_v55  ;;  %v1590_v25 = vmul.f32 0.03125, %v2960_v15  ;;  %v1573_v4 = vpop.f32.mrb[7].mxu1 }
 0x1bf   :  { %v1599_v35 = vadd.f32 1e-05, %v1595_v3  ;;  %v1589_v26 = vmul.f32 0.03125, %v1573_v4 }
 0x1c0   :  { %3456 = vrsqrt.f32 %v1600_v21  ;;  %v1598_v13 = vsub.f32 %v1590_v25, %v1594_v16 }
 0x1c1   :  { %3458 = vrsqrt.f32 %v1599_v35  ;;  %v1597_v48 = vsub.f32 %v1589_v26, %v1593_v31 }
 0x1c2   :  { %v1602_v52 = vadd.f32 1e-05, %v1598_v13 }
 0x1c3   :  { %v1601_v9 = vadd.f32 1e-05, %v1597_v48 }
 0x1c4   :  { %3460 = vrsqrt.f32 %v1602_v52 }
 0x1c5   :  { %3462 = vrsqrt.f32 %v1601_v9 }
 0x1ca   :  { %v3457_v60 = vpop.eup %3456 }
 0x1cb   :  { %v3459_v62 = vpop.eup %3458  ;;  %v1612_v63 = vsel %vm1607_vm1, %v3457_v60, 0 }
 0x1cc   :  { %v1609_v20 = vsel %vm1607_vm1, %v3459_v62, 0  ;;  %v1700_v27 = vand.u32 4294901760, %v1612_v63 }
 0x1cd   :  { %v1690_v10 = vand.u32 4294901760, %v1609_v20 }
 0x1ce   :  { %v3461_v17 = vpop.eup %3460  ;;  %v1701_v45 = vsub.f32 %v1612_v63, %v1700_v27 }
 0x1cf   :  { %v3463_v0 = vpop.eup %3462  ;;  %v1691_v47 = vsub.f32 %v1609_v20, %v1690_v10  ;;  %v1618_v58 = vsel %vm1607_vm1, %v3461_v17, 0 }
 0x1d0   :  { %v1702_v34 = vand.u32 4294901760, %v1701_v45  ;;  %v1615_v49 = vsel %vm1607_vm1, %v3463_v0, 0  ;;  %v1720_v56 = vand.u32 4294901760, %v1618_v58 }
 0x1d1   :  { %v1692_v1 = vand.u32 4294901760, %v1691_v47  ;;  %v1710_v32 = vand.u32 4294901760, %v1615_v49 }
 0x1d2   :  { %v1703_v37 = vsub.f32 %v1701_v45, %v1702_v34  ;;  %v1721_v46 = vsub.f32 %v1618_v58, %v1720_v56 }
 0x1d3   :  { %v1693_v14 = vsub.f32 %v1691_v47, %v1692_v1  ;;  %v1711_v19 = vsub.f32 %v1615_v49, %v1710_v32 }
 0x1d4   :  { %v1722_v22 = vand.u32 4294901760, %v1721_v46  ;;  %v1704_v57 = vand.u32 4294901760, %v1703_v37 }
 0x1d5   :  { %v1694_v28 = vand.u32 4294901760, %v1693_v14  ;;  %v1712_v39 = vand.u32 4294901760, %v1711_v19 }
 0x1d6   :  { %v1723_v18 = vsub.f32 %v1721_v46, %v1722_v22 }
 0x1d7   :  { %2963 = vmatprep.mubr.f32.mxu0 %v1694_v28  ;;  %v1713_v50 = vsub.f32 %v1711_v19, %v1712_v39 }
 0x1d8   :  { %2964 = vmatmul.mubr.f32.vlgmr.msra.gmra.mrb[4].mxu0 %v1704_v57  ;;  %v1724_v6 = vand.u32 4294901760, %v1723_v18 }
 0x1d9   :  { %2970 = vmatpush3.msra.mxu0 %v4119_v30  ;;  %v1714_v51 = vand.u32 4294901760, %v1713_v50  ;;  %v2234_v30 = vld [vmem:[%s4151_s1] ss:$0 sm:$0xff]  ;;  %s3464_s1 = scalar_lea.vmem %s2224_s5, 512 }
 0x1da   :  { %2977 = vmatprep.subr.mxu0 %v4112_v2  ;;  %p3465_p0 = scmp.ne.s32.totalorder %s2224_s5, %s3464_s1  ;;  %p3470_p2 = scmp.lt.s32.totalorder %s3464_s1, %s3464_s1 }
 0x1db   :  { %2966 = vmatprep.mubr.f32.mxu0 %v1714_v51 }
 0x1dc   :  { %2967 = vmatmul.mubr.f32.gmra.mrb[6].mxu0 %v1724_v6  ;;  %p3471_p3 = por %p3470_p2, %p3469_p1 }
 0x1dd   :  { %2971 = vmatprep.mubr.f32.mxu0 %v1690_v10 }
 0x1de   :  { %p3472_p4 = pnand %p3471_p3, %p3465_p0 }
 0x1e0   :  { %2972 = vmatmul.mubr.f32.vlgmr.msra.gmra.mrb[4].mxu0 %v1700_v27 }
 0x1e1   :  { %2978 = vmatpush3.msra.mxu0 %v4112_v2  ;;  %2974 = vmatprep.mubr.f32.mxu0 %v1710_v32 }
 0x1e2   :  { %2985 = vmatprep.subr.mxu0 %v4107_v59 }
 0x1e4   :  { %2975 = vmatmul.mubr.f32.gmra.mrb[6].mxu0 %v1720_v56 }
 0x1e5   :  { %2979 = vmatprep.mubr.f32.mxu0 %v1691_v47 }
 0x1e8   :  { %2980 = vmatmul.mubr.f32.vlgmr.msra.gmra.mrb[4].mxu0 %v1701_v45 }
 0x1e9   :  { %2986 = vmatpush3.msra.mxu0 %v4107_v59  ;;  %2982 = vmatprep.mubr.f32.mxu0 %v1711_v19 }
 0x1ea   :  { %2993 = vmatprep.subr.mxu0 %v4115_v8 }
 0x1ec   :  { %2983 = vmatmul.mubr.f32.gmra.mrb[6].mxu0 %v1721_v46 }
 0x1ed   :  { %2987 = vmatprep.mubr.f32.mxu0 %v1692_v1 }
 0x1f0   :  { %2988 = vmatmul.mubr.f32.vlgmr.msra.gmra.mrb[4].mxu0 %v1702_v34 }
 0x1f1   :  { %2994 = vmatpush3.msra.mxu0 %v4115_v8  ;;  %2990 = vmatprep.mubr.f32.mxu0 %v1712_v39 }
 0x1f2   :  { %3001 = vmatprep.subr.mxu0 %v4107_v59 }
 0x1f4   :  { %2991 = vmatmul.mubr.f32.gmra.mrb[6].mxu0 %v1722_v22 }
 0x1f5   :  { %2995 = vmatprep.mubr.f32.mxu0 %v1690_v10 }
 0x1f8   :  { %2996 = vmatmul.mubr.f32.vlgmr.msra.gmra.mrb[4].mxu0 %v1700_v27 }
 0x1f9   :  { %3002 = vmatpush3.msra.mxu0 %v4107_v59  ;;  %2998 = vmatprep.mubr.f32.mxu0 %v1710_v32 }
 0x1fc   :  { %2999 = vmatmul.mubr.f32.gmra.mrb[6].mxu0 %v1720_v56 }
 0x1fd   :  { %3003 = vmatprep.mubr.f32.mxu0 %v1690_v10 }
 0x200   :  { %3004 = vmatmul.mubr.f32.vlgmr.msra.gmra.mrb[4].mxu0 %v1700_v27 }
 0x201   :  { %3006 = vmatprep.mubr.f32.mxu0 %v1710_v32 }
 0x204   :  { %3007 = vmatmul.mubr.f32.gmra.mrb[6].mxu0 %v1720_v56 }
 0x2d3   :  { %v3005_v2 = vpop.f32.mrb[4].mxu0 }
 0x2d4   :  { %v2201_v8 = vmul.f32 %v3005_v2, %v3646_v5  ;;  %v2177_v11 = vpop.f32.mrb[5].mxu0 }
 0x2d5   :  { %v2200_v42 = vmul.f32 %v2177_v11, %v4188_v61 }
 0x2d6   :  { %v2211_v43 = vmul.f32 %v2234_v30, %v2201_v8 }
 0x2d7   :  { %v2210_v33 = vmul.f32 %v2234_v30, %v2200_v42  ;;  %v3008_v53 = vpop.f32.mrb[6].mxu0 }
 0x2d8   :  { %2215 = vst [vmem:[#allocation2 + $0x8] sm:$0xff] %v2211_v43  ;;  %v2203_v59 = vmul.f32 %v3008_v53, %v3732_v40  ;;  %v2189_v12 = vpop.f32.mrb[7].mxu0 }
 0x2d9   :  { %2214 = vst [vmem:[#allocation2] sm:$0xff] %v2210_v33  ;;  %v2202_v36 = vmul.f32 %v2189_v12, %v3723_v38 }
 0x2da   :  { %v2213_v7 = vmul.f32 %v2234_v30, %v2203_v59 }
 0x2db   :  { %v2212_v23 = vmul.f32 %v2234_v30, %v2202_v36 }
 0x2dc   :  { %2217 = vst [vmem:[#allocation2 + $0x18] sm:$0xff] %v2213_v7 }
 0x2dd   :  { %2216 = vst [vmem:[#allocation2 + $0x10] sm:$0xff] %v2212_v23 }
 0x2de   :  { %3475 = shalt.err (!%p3472_p4)
}
 0x2df   :  { %s3476_s8 = scalar_lea.hbm %s4154_s4, 512 }
 0x2e0   :  { %p3477_p5 = scmp.ne.s32.totalorder %s4154_s4, %s3476_s8  ;;  %p3480_p6 = scmp.lt.u32.totalorder %s3476_s8, %s4154_s4 }
 0x2e2   :  { %p3482_p7 = pnand %p3480_p6, %p3477_p5 }
 0x2e4   :  { %3485 = shalt.err (!%p3482_p7)
}
 0x2e5   :  { %s3489_s13 = smov 128   ;;  %s3490_s14 = smov 8  }
 0x2e6   :  { %2229 = dma.vmem_to_hbm [thread:$0]  %s2224_s5, 512, %s4154_s4, [#allocation3], %s3489_s13, %s3489_s13, %s3490_s14  }
 0x2e7   :  { %3486 = dma.done.wait [#allocation3], 512  }
 0x2e8   :  { %3487 = vsyncadd [#allocation3], 4294966784 }
 0x2e9   :  { %2233 = vsyncpa [#allocation3], 1 }

</bundles_post_ra>
